<compile_context>
chip_gen: v5e
topology: v5e:2x2
jax: 0.10.0
libtpu: 0.0.40
codegen_flags: <defaults>
</compile_context>

<pallas_src>
import functools

import jax
import jax.numpy as jnp
from jax.experimental import pallas as pl
from jax.experimental.pallas import tpu as pltpu


def _round_up(x, m):
    return ((x + m - 1) // m) * m


def _mlp_kernel(n_layers, vpu_first_layer, *refs):
    """Whole-MLP forward for one batch tile, feature-major (features, batch).

    refs = (x_ref, w_0..w_{L-1}, b_0..b_{L-1}, o_ref)
      x_ref : (dim, bt)       input tile, batch on the 128-lane axis
      w_i   : (out_i, in_i)   torch-layout weight, resident in VMEM
      b_i   : (out_i, 1)      f32 bias column, broadcast over batch lanes
      o_ref : (out_dim, bt)   output tile
    """
    x_ref = refs[0]
    w_refs = refs[1:1 + n_layers]
    b_refs = refs[1 + n_layers:1 + 2 * n_layers]
    o_ref = refs[-1]

    h = x_ref[...]                                 # compute dtype (bf16 or f32)

    for li in range(n_layers):
        w = w_refs[li][...]                        # (out, in)
        b = b_refs[li][...]                        # (out, 1) f32

        if li == 0 and vpu_first_layer:
            # K = dim is tiny: unrolled VPU broadcast-FMA, skip the MXU.
            wf = w.astype(jnp.float32)
            hf = h.astype(jnp.float32)
            acc = wf[:, 0:1] * hf[0:1, :]
            for k in range(1, hf.shape[0]):
                acc = acc + wf[:, k:k + 1] * hf[k:k + 1, :]
            h = acc + b                            # (out, bt) f32
        else:
            # bf16 x bf16 (or f32 x f32) on the MXU, f32 accumulation.
            h = jnp.dot(w, h, preferred_element_type=jnp.float32) + b

        if li < n_layers - 1:
            h = jnp.maximum(h, 0.0)                # ReLU in f32 (v5e-safe VPU)
            h = h.astype(w_refs[li + 1].dtype)     # bf16 operand for next dot

    o_ref[...] = h.astype(o_ref.dtype)


def _pick_batch_tile(n_padded):
    """Batch columns per grid step.

    Single step only for tiny (<=128) batches; otherwise guarantee >= 2 steps
    (v7x megacore sharding via "parallel") with 128-aligned lanes, capped at
    2048 columns/step (amortizes the ~0.35us per-step pipeline overhead while
    keeping the (32, bt) f32 intermediates small).
    """
    if n_padded <= 128:
        return n_padded
    return min(2048, _round_up(pl.cdiv(n_padded, 2), 128))


def _relunet_forward_fm(xt, weights, biases, *, compute_dtype=jnp.bfloat16,
                        batch_tile=None):
    """Feature-major forward: xt is (dim, N); returns (out_dim, N) in xt.dtype."""
    dim, n = xt.shape
    n_layers = len(weights)
    assert len(biases) == n_layers
    out_dim = weights[-1].shape[0]
    out_dtype = xt.dtype

    # Static tiling / padding decisions (shapes are known at trace time).
    if batch_tile is None:
        batch_tile = _pick_batch_tile(_round_up(n, 128))
    else:
        batch_tile = _round_up(batch_tile, 128)
    n_pad = _round_up(n, batch_tile)
    grid = (n_pad // batch_tile,)

    # Dtype / layout plumbing: fused by XLA inside the enclosing jit.
    xt_c = xt.astype(compute_dtype)
    if n_pad != n:
        xt_c = jnp.pad(xt_c, ((0, 0), (0, n_pad - n)))     # zero batch columns
    w_c = [w.astype(compute_dtype) for w in weights]
    b_c = [b.reshape(-1, 1).astype(jnp.float32) for b in biases]

    vpu_first = weights[0].shape[1] <= 8
    kernel = functools.partial(_mlp_kernel, n_layers, vpu_first)

    # Input tile: full feature dim x batch_tile lanes, tiled along batch.
    in_specs = [pl.BlockSpec((dim, batch_tile), lambda i: (0, i))]
    # Weights / biases: full-array blocks with constant index_map (resident).
    for w in w_c:
        in_specs.append(pl.BlockSpec(w.shape, lambda i: (0, 0)))
    for b in b_c:
        in_specs.append(pl.BlockSpec(b.shape, lambda i: (0, 0)))
    out_spec = pl.BlockSpec((out_dim, batch_tile), lambda i: (0, i))

    grid_spec = pltpu.PrefetchScalarGridSpec(
        num_scalar_prefetch=0,
        grid=grid,
        in_specs=in_specs,
        out_specs=out_spec,
    )

    yt = pl.pallas_call(
        kernel,
        out_shape=jax.ShapeDtypeStruct((out_dim, n_pad), out_dtype),
        grid_spec=grid_spec,
        compiler_params=pltpu.CompilerParams(
            dimension_semantics=("parallel",),
            # A few hundred KB actually used; 32 MiB is safe on all of
            # v5e/v6e (128 MiB physical) and v7x (64 MiB physical).
            vmem_limit_bytes=32 * 1024 * 1024,
        ),
    )(xt_c, *w_c, *b_c)

    return yt[:, :n] if n_pad != n else yt


# Feature-major entry point (no HBM transposes anywhere).
relunet_forward_fm = jax.jit(
    _relunet_forward_fm, static_argnames=("compute_dtype", "batch_tile"))


def _relunet_forward_bm(x, weights, biases, *, compute_dtype=jnp.bfloat16,
                        batch_tile=None):
    """Batch-major convenience wrapper: x is (N, dim); returns (N, dim).

    transpose -> pallas_call -> transpose lives inside one jit so XLA can
    fuse/elide the layout changes instead of doing extra HBM passes.
    """
    yt = _relunet_forward_fm(x.T, weights, biases,
                             compute_dtype=compute_dtype,
                             batch_tile=batch_tile)
    return yt.T


relunet_forward = jax.jit(
    _relunet_forward_bm, static_argnames=("compute_dtype", "batch_tile"))


def init_relunet_params(key, dim, width):
    """PyTorch-default init U(-1/sqrt(fan_in), 1/sqrt(fan_in)), torch layout.

    Weights: (out, in); biases: (out,) — exactly nn.Linear's native layout.
    """
    sizes = [dim] + list(width) + [dim]
    weights, biases = [], []
    for li in range(len(sizes) - 1):
        fan_in, fan_out = sizes[li], sizes[li + 1]
        key, kw, kb = jax.random.split(key, 3)
        bound = 1.0 / float(fan_in) ** 0.5
        weights.append(jax.random.uniform(kw, (fan_out, fan_in), jnp.float32,
                                          minval=-bound, maxval=bound))
        biases.append(jax.random.uniform(kb, (fan_out,), jnp.float32,
                                         minval=-bound, maxval=bound))
    return weights, biases


def relunet_reference(x, weights, biases):
    """Plain-JAX f32 reference with torch semantics: h = h @ W.T + b."""
    h = x
    for li in range(len(weights)):
        h = h @ weights[li].T + biases[li][None, :]
        if li < len(weights) - 1:
            h = jnp.maximum(h, 0.0)
    return h


if __name__ == "__main__":
    # benchmark.dimension = 4 (state dimension), hidden widths = [32, 32]
    dim = 4
    width = [32, 32]
    batch = 16

    key = jax.random.PRNGKey(0)
    key, kx = jax.random.split(key)
    x = jax.random.normal(kx, (batch, dim), jnp.float32)
    weights, biases = init_relunet_params(key, dim, width)

    ref = relunet_reference(x, weights, biases)

    # 1) f32 compute path (tight numerical check), batch-major wrapper.
    out_f32 = jax.block_until_ready(
        relunet_forward(x, weights, biases, compute_dtype=jnp.float32))
    assert out_f32.shape == (batch, dim)
    assert jnp.allclose(out_f32, ref, atol=1e-5, rtol=1e-5), "f32 mismatch"

    # 2) Default bf16-operand / f32-accumulate path, feature-major entry
    #    point (no transposes in the measured path).
    out_bf16_t = jax.block_until_ready(relunet_forward_fm(x.T, weights, biases))
    assert out_bf16_t.shape == (dim, batch)
    assert jnp.allclose(out_bf16_t.T, ref, atol=3e-2, rtol=3e-2), "bf16 mismatch"

    # 3) Non-multiple-of-128 batch: exercises zero-padding + a 2-step
    #    "parallel" grid (v7x megacore path), bf16 default.
    n2 = 300
    key, kx2 = jax.random.split(key)
    x2 = jax.random.normal(kx2, (n2, dim), jnp.float32)
    ref2 = relunet_reference(x2, weights, biases)
    out2 = jax.block_until_ready(relunet_forward(x2, weights, biases))
    assert out2.shape == (n2, dim)
    assert jnp.allclose(out2, ref2, atol=3e-2, rtol=3e-2), "padded-batch mismatch"

    print("KERNEL_OK")
</pallas_src>

<mosaic_0001>
module attributes {stable_mosaic.version = 11 : i64} {
  func.func @_mlp_kernel(%arg0: i32, %arg1: memref<4x128xf32, #tpu.memory_space<vmem>>, %arg2: memref<32x4xf32, #tpu.memory_space<vmem>>, %arg3: memref<32x32xf32, #tpu.memory_space<vmem>>, %arg4: memref<4x32xf32, #tpu.memory_space<vmem>>, %arg5: memref<32x1xf32, #tpu.memory_space<vmem>>, %arg6: memref<32x1xf32, #tpu.memory_space<vmem>>, %arg7: memref<4x1xf32, #tpu.memory_space<vmem>>, %arg8: memref<4x128xf32, #tpu.memory_space<vmem>>) attributes {dimension_semantics = [#tpu.dimension_semantics<parallel>], iteration_bounds = array<i64: 1>, scalar_prefetch = 0 : i64, scratch_operands = 0 : i64, tpu.core_type = #tpu.core_type<tc>, window_params = [{transform_indices = @transform_0, window_bounds = array<i64: 4, 128>}, {pipeline_mode = #tpu.pipeline_mode<synchronous>, transform_indices = @transform_1, window_bounds = array<i64: 32, 4>}, {pipeline_mode = #tpu.pipeline_mode<synchronous>, transform_indices = @transform_2, window_bounds = array<i64: 32, 32>}, {pipeline_mode = #tpu.pipeline_mode<synchronous>, transform_indices = @transform_3, window_bounds = array<i64: 4, 32>}, {pipeline_mode = #tpu.pipeline_mode<synchronous>, transform_indices = @transform_4, window_bounds = array<i64: 32, 1>}, {pipeline_mode = #tpu.pipeline_mode<synchronous>, transform_indices = @transform_5, window_bounds = array<i64: 32, 1>}, {pipeline_mode = #tpu.pipeline_mode<synchronous>, transform_indices = @transform_6, window_bounds = array<i64: 4, 1>}, {transform_indices = @transform_7, window_bounds = array<i64: 4, 128>}]} {
    %c0 = arith.constant 0 : index
    %c0_0 = arith.constant 0 : index
    %0 = vector.load %arg1[%c0, %c0_0] : memref<4x128xf32, #tpu.memory_space<vmem>>, vector<4x128xf32>
    %c0_1 = arith.constant 0 : index
    %c0_2 = arith.constant 0 : index
    %1 = vector.load %arg2[%c0_1, %c0_2] : memref<32x4xf32, #tpu.memory_space<vmem>>, vector<32x4xf32>
    %c0_3 = arith.constant 0 : index
    %c0_4 = arith.constant 0 : index
    %2 = vector.load %arg5[%c0_3, %c0_4] : memref<32x1xf32, #tpu.memory_space<vmem>>, vector<32x1xf32>
    %3 = vector.extract_strided_slice %1 {offsets = [0, 0], sizes = [32, 1], strides = [1, 1]} : vector<32x4xf32> to vector<32x1xf32>
    %4 = vector.extract_strided_slice %0 {offsets = [0, 0], sizes = [1, 128], strides = [1, 1]} : vector<4x128xf32> to vector<1x128xf32>
    %5 = vector.broadcast %3 : vector<32x1xf32> to vector<32x128xf32>
    %6 = vector.broadcast %4 : vector<1x128xf32> to vector<32x128xf32>
    %7 = arith.mulf %5, %6 : vector<32x128xf32>
    %8 = vector.extract_strided_slice %1 {offsets = [0, 1], sizes = [32, 1], strides = [1, 1]} : vector<32x4xf32> to vector<32x1xf32>
    %9 = vector.extract_strided_slice %0 {offsets = [1, 0], sizes = [1, 128], strides = [1, 1]} : vector<4x128xf32> to vector<1x128xf32>
    %10 = vector.broadcast %8 : vector<32x1xf32> to vector<32x128xf32>
    %11 = vector.broadcast %9 : vector<1x128xf32> to vector<32x128xf32>
    %12 = arith.mulf %10, %11 : vector<32x128xf32>
    %13 = arith.addf %7, %12 : vector<32x128xf32>
    %14 = vector.extract_strided_slice %1 {offsets = [0, 2], sizes = [32, 1], strides = [1, 1]} : vector<32x4xf32> to vector<32x1xf32>
    %15 = vector.extract_strided_slice %0 {offsets = [2, 0], sizes = [1, 128], strides = [1, 1]} : vector<4x128xf32> to vector<1x128xf32>
    %16 = vector.broadcast %14 : vector<32x1xf32> to vector<32x128xf32>
    %17 = vector.broadcast %15 : vector<1x128xf32> to vector<32x128xf32>
    %18 = arith.mulf %16, %17 : vector<32x128xf32>
    %19 = arith.addf %13, %18 : vector<32x128xf32>
    %20 = vector.extract_strided_slice %1 {offsets = [0, 3], sizes = [32, 1], strides = [1, 1]} : vector<32x4xf32> to vector<32x1xf32>
    %21 = vector.extract_strided_slice %0 {offsets = [3, 0], sizes = [1, 128], strides = [1, 1]} : vector<4x128xf32> to vector<1x128xf32>
    %22 = vector.broadcast %20 : vector<32x1xf32> to vector<32x128xf32>
    %23 = vector.broadcast %21 : vector<1x128xf32> to vector<32x128xf32>
    %24 = arith.mulf %22, %23 : vector<32x128xf32>
    %25 = arith.addf %19, %24 : vector<32x128xf32>
    %26 = vector.broadcast %2 : vector<32x1xf32> to vector<32x128xf32>
    %27 = arith.addf %25, %26 : vector<32x128xf32>
    %cst = arith.constant 0.000000e+00 : f32
    %28 = vector.broadcast %cst : f32 to vector<32x128xf32>
    %29 = arith.maximumf %27, %28 : vector<32x128xf32>
    %c0_5 = arith.constant 0 : index
    %c0_6 = arith.constant 0 : index
    %30 = vector.load %arg3[%c0_5, %c0_6] : memref<32x32xf32, #tpu.memory_space<vmem>>, vector<32x32xf32>
    %c0_7 = arith.constant 0 : index
    %c0_8 = arith.constant 0 : index
    %31 = vector.load %arg6[%c0_7, %c0_8] : memref<32x1xf32, #tpu.memory_space<vmem>>, vector<32x1xf32>
    %cst_9 = arith.constant dense<0.000000e+00> : vector<32x128xf32>
    %32 = tpu.matmul %30, %29, %cst_9 {dimension_numbers = #tpu.dot_dimension_numbers<[1], [0], [0], [1], [0, 0, 1, 1], [], []>} : vector<32x32xf32>, vector<32x128xf32>, vector<32x128xf32> -> vector<32x128xf32>
    %33 = vector.broadcast %31 : vector<32x1xf32> to vector<32x128xf32>
    %34 = arith.addf %32, %33 : vector<32x128xf32>
    %cst_10 = arith.constant 0.000000e+00 : f32
    %35 = vector.broadcast %cst_10 : f32 to vector<32x128xf32>
    %36 = arith.maximumf %34, %35 : vector<32x128xf32>
    %c0_11 = arith.constant 0 : index
    %c0_12 = arith.constant 0 : index
    %37 = vector.load %arg4[%c0_11, %c0_12] : memref<4x32xf32, #tpu.memory_space<vmem>>, vector<4x32xf32>
    %c0_13 = arith.constant 0 : index
    %c0_14 = arith.constant 0 : index
    %38 = vector.load %arg7[%c0_13, %c0_14] : memref<4x1xf32, #tpu.memory_space<vmem>>, vector<4x1xf32>
    %cst_15 = arith.constant dense<0.000000e+00> : vector<4x128xf32>
    %39 = tpu.matmul %37, %36, %cst_15 {dimension_numbers = #tpu.dot_dimension_numbers<[1], [0], [0], [1], [0, 0, 1, 1], [], []>} : vector<4x32xf32>, vector<32x128xf32>, vector<4x128xf32> -> vector<4x128xf32>
    %40 = vector.broadcast %38 : vector<4x1xf32> to vector<4x128xf32>
    %41 = arith.addf %39, %40 : vector<4x128xf32>
    %c0_16 = arith.constant 0 : index
    %c0_17 = arith.constant 0 : index
    %42 = vector.load %arg8[%c0_16, %c0_17] : memref<4x128xf32, #tpu.memory_space<vmem>>, vector<4x128xf32>
    tpu.vector_store %arg8[%c0_16, %c0_17], %41 {strides = array<i32>} : memref<4x128xf32, #tpu.memory_space<vmem>>, vector<4x128xf32>,
    return
  }
  func.func @transform_0(%arg0: i32) -> (i32, i32) {
    %c0_i32 = arith.constant 0 : i32
    %c0_i32_0 = arith.constant 0 : i32
    return %c0_i32, %arg0 : i32, i32
  }
  func.func @transform_1(%arg0: i32) -> (i32, i32) {
    %c0_i32 = arith.constant 0 : i32
    %c0_i32_0 = arith.constant 0 : i32
    %c0_i32_1 = arith.constant 0 : i32
    return %c0_i32, %c0_i32_0 : i32, i32
  }
  func.func @transform_2(%arg0: i32) -> (i32, i32) {
    %c0_i32 = arith.constant 0 : i32
    %c0_i32_0 = arith.constant 0 : i32
    %c0_i32_1 = arith.constant 0 : i32
    return %c0_i32, %c0_i32_0 : i32, i32
  }
  func.func @transform_3(%arg0: i32) -> (i32, i32) {
    %c0_i32 = arith.constant 0 : i32
    %c0_i32_0 = arith.constant 0 : i32
    %c0_i32_1 = arith.constant 0 : i32
    return %c0_i32, %c0_i32_0 : i32, i32
  }
  func.func @transform_4(%arg0: i32) -> (i32, i32) {
    %c0_i32 = arith.constant 0 : i32
    %c0_i32_0 = arith.constant 0 : i32
    %c0_i32_1 = arith.constant 0 : i32
    return %c0_i32, %c0_i32_0 : i32, i32
  }
  func.func @transform_5(%arg0: i32) -> (i32, i32) {
    %c0_i32 = arith.constant 0 : i32
    %c0_i32_0 = arith.constant 0 : i32
    %c0_i32_1 = arith.constant 0 : i32
    return %c0_i32, %c0_i32_0 : i32, i32
  }
  func.func @transform_6(%arg0: i32) -> (i32, i32) {
    %c0_i32 = arith.constant 0 : i32
    %c0_i32_0 = arith.constant 0 : i32
    %c0_i32_1 = arith.constant 0 : i32
    return %c0_i32, %c0_i32_0 : i32, i32
  }
  func.func @transform_7(%arg0: i32) -> (i32, i32) {
    %c0_i32 = arith.constant 0 : i32
    %c0_i32_0 = arith.constant 0 : i32
    return %c0_i32, %arg0 : i32, i32
  }
}

</mosaic_0001>

<bundles_post_ra>
// kernel: _relunet_forward_bm.1
= control target key start
LH: loop header
LB: loop body
LE: loop exit
PB: predicated region body
PF: predicated region fallthrough
CT: control target
= control target key end

     0   :  { %v306_v0 = vmov 2   ;;  %v307_v1 = vmov 0   ;;  %v308_v5 = vmov 1   ;;  %v309_v6 = vmov 3   ;;  %s415_s1 = inlined_call_operand.vmem [shape: f32[32,4], index: 1, kind: input, shape index: {}]   ;;  %s416_s4 = inlined_call_operand.vmem [shape: f32[32,1], index: 4, kind: input, shape index: {}]   ;;  %s417_s5 = inlined_call_operand.vmem [shape: f32[32,1], index: 5, kind: input, shape index: {}]   ;;  %s418_s6 = inlined_call_operand.vmem [shape: f32[4,1], index: 6, kind: input, shape index: {}]   ;;  %s419_s0 = inlined_call_operand.vmem [shape: f32[4,128], index: 0, kind: input, shape index: {}]   ;;  %s420_s2 = inlined_call_operand.vmem [shape: f32[32,32], index: 2, kind: input, shape index: {}]   ;;  %s421_s3 = inlined_call_operand.vmem [shape: f32[4,32], index: 3, kind: input, shape index: {}]   ;;  %s422_s7 = inlined_call_operand.vmem [shape: f32[4,128], index: 7, kind: output, shape index: {}]  }
   0x1   :  { %293 = vset.pattern.permute.xlu2 %v306_v0  ;;  %291 = vset.pattern.permute.xlu1 %v307_v1  ;;  %v30_v2 = vld [vmem:[%s415_s1 + $0x18] sm:$0xff]  ;;  %v29_v3 = vld [vmem:[%s415_s1 + $0x10] sm:$0xff]  ;;  %v28_v4 = vld [vmem:[%s415_s1 + $0x8] sm:$0xff]  ;;  %vm191_vm0 = vcmask 261120  }
   0x2   :  { %289 = vset.pattern.permute.xlu0 %v307_v1  ;;  %98 = vperm.xlu2 %293, %v30_v2   ;;  %v27_v7 = vld [vmem:[%s415_s1] sm:$0xff]  ;;  %v32_v8 = vld [vmem:[%s416_s4 + $0x8] sm:$0xff]  ;;  %v34_v10 = vld [vmem:[%s416_s4 + $0x18] sm:$0xff] }
   0x3   :  { %52 = vperm.xlu0 %289, %v30_v2   ;;  %47 = vperm.xlu1 %291, %v29_v3   ;;  %v167_v9 = vld [vmem:[%s417_s5] sm:$0xff]  ;;  %v33_v11 = vld [vmem:[%s416_s4 + $0x10] sm:$0xff]  ;;  %v170_v13 = vld [vmem:[%s417_s5 + $0x18] sm:$0xff] }
   0x4   :  { %v31_v12 = vld [vmem:[%s416_s4] sm:$0xff]  ;;  %v169_v14 = vld [vmem:[%s417_s5 + $0x10] sm:$0xff]  ;;  %v168_v15 = vld [vmem:[%s417_s5 + $0x8] sm:$0xff] }
   0x5   :  { %v238_v16 = vld [vmem:[%s418_s6] sm:$0xf] }
   0x6   :  { %v26_v23 = vld [vmem:[%s419_s0] sm:$0xf] }
   0x7   :  { %v76_v24 = vperm.slane %v26_v23, 1  ;;  %v55_v25 = vperm.slane %v26_v23, 0  ;;  %v101_v30 = vperm.slane %v26_v23, 2  ;;  %v126_v35 = vperm.slane %v26_v23, 3 }
   0xa   :  { %294 = vset.pattern.permute.xlu2 %v307_v1 }
   0xb   :  { %290 = vset.pattern.permute.xlu0 %v308_v5  ;;  %292 = vset.pattern.permute.xlu1 %v308_v5 }
   0xc   :  { %73 = vperm.xlu0 %290, %v30_v2   ;;  %69 = vperm.xlu1 %292, %v29_v3  }
   0xd   :  { %42 = vperm.xlu2 %294, %v28_v4  }
  0x14   :  { %296 = vset.pattern.permute.xlu0 %v309_v6  ;;  %65 = vperm.xlu1 %292, %v28_v4  }
  0x15   :  { %295 = vset.pattern.permute.xlu2 %v306_v0  ;;  %123 = vperm.xlu0 %296, %v30_v2  }
  0x16   :  { %94 = vperm.xlu2 %295, %v29_v3  }
  0x1c   :  { %297 = vset.pattern.permute.xlu1 %v307_v1 }
  0x1d   :  { %37 = vperm.xlu1 %297, %v27_v7   ;;  %301 = vset.pattern.permute.xlu0 %v306_v0 }
  0x1e   :  { %298 = vset.pattern.permute.xlu2 %v308_v5  ;;  %86 = vperm.xlu0 %301, %v27_v7  }
  0x1f   :  { %61 = vperm.xlu2 %298, %v27_v7  }
  0x25   :  { %299 = vset.pattern.permute.xlu1 %v306_v0 }
  0x26   :  { %90 = vperm.xlu1 %299, %v28_v4   ;;  %304 = vset.pattern.permute.xlu0 %v307_v1 }
  0x27   :  { %300 = vset.pattern.permute.xlu2 %v309_v6  ;;  %142 = vperm.xlu0 %304, %v32_v8  }
  0x28   :  { %119 = vperm.xlu2 %300, %v29_v3  }
  0x2e   :  { %302 = vset.pattern.permute.xlu1 %v309_v6 }
  0x2f   :  { %115 = vperm.xlu1 %302, %v28_v4   ;;  %173 = vperm.xlu0 %304, %v167_v9  }
  0x30   :  { %303 = vset.pattern.permute.xlu2 %v307_v1 }
  0x31   :  { %152 = vperm.xlu2 %303, %v34_v10  }
  0x37   :  { %111 = vperm.xlu1 %302, %v27_v7  }
  0x39   :  { %147 = vperm.xlu2 %303, %v33_v11  }
  0x3f   :  { %305 = vset.pattern.permute.xlu1 %v307_v1 }
  0x40   :  { %137 = vperm.xlu1 %305, %v31_v12  }
  0x41   :  { %188 = vperm.xlu2 %303, %v170_v13  }
  0x48   :  { %183 = vperm.xlu1 %305, %v169_v14   ;;  %v163_v14 = vld [vmem:[%s420_s2] sm:$0xff] }
  0x49   :  { %178 = vperm.xlu2 %303, %v168_v15   ;;  %v164_v15 = vld [vmem:[%s420_s2 + $0x8] sm:$0xff] }
  0x50   :  { %241 = vperm.xlu1 %305, %v238_v16   ;;  %v165_v16 = vld [vmem:[%s420_s2 + $0x10] sm:$0xff] }
  0x5c   :  { %v99_v17 = vpop.permute.xlu2 %98 }
  0x5d   :  { %v105_v33 = vmul.f32 %v101_v30, %v99_v17  ;;  %v166_v17 = vld [vmem:[%s420_s2 + $0x18] sm:$0xff] }
  0x67   :  { %v43_v18 = vpop.permute.xlu2 %42 }
  0x68   :  { %v57_v57 = vmul.f32 %v55_v25, %v43_v18 }
  0x70   :  { %v95_v19 = vpop.permute.xlu2 %94 }
  0x71   :  { %v104_v41 = vmul.f32 %v101_v30, %v95_v19 }
  0x75   :  { %v48_v20 = vpop.permute.xlu1 %47  ;;  %v53_v21 = vpop.permute.xlu0 %52 }
  0x76   :  { %v59_v28 = vmul.f32 %v55_v25, %v53_v21  ;;  %v58_v38 = vmul.f32 %v55_v25, %v48_v20 }
  0x79   :  { %v62_v22 = vpop.permute.xlu2 %61 }
  0x7a   :  { %v77_v2 = vmul.f32 %v76_v24, %v62_v22 }
  0x7e   :  { %v74_v26 = vpop.permute.xlu0 %73  ;;  %v70_v27 = vpop.permute.xlu1 %69 }
  0x7f   :  { %v80_v29 = vmul.f32 %v76_v24, %v74_v26  ;;  %v79_v34 = vmul.f32 %v76_v24, %v70_v27 }
  0x81   :  { %v84_v32 = vadd.f32 %v80_v29, %v59_v28  ;;  %v83_v42 = vadd.f32 %v79_v34, %v58_v38  ;;  %v237_v34 = vld [vmem:[%s421_s3] sm:$0xf] }
  0x82   :  { %v120_v31 = vpop.permute.xlu2 %119 }
  0x83   :  { %v109_v40 = vadd.f32 %v105_v33, %v84_v32  ;;  %v129_v46 = vmul.f32 %v126_v35, %v120_v31  ;;  %v108_v48 = vadd.f32 %v104_v41, %v83_v42 }
  0x85   :  { %v133_v50 = vadd.f32 %v129_v46, %v108_v48 }
  0x86   :  { %v66_v36 = vpop.permute.xlu1 %65 }
  0x87   :  { %v124_v37 = vpop.permute.xlu0 %123  ;;  %v78_v56 = vmul.f32 %v76_v24, %v66_v36 }
  0x88   :  { %v130_v39 = vmul.f32 %v126_v35, %v124_v37 }
  0x89   :  { %v82_v59 = vadd.f32 %v78_v56, %v57_v57 }
  0x8a   :  { %v134_v43 = vadd.f32 %v130_v39, %v109_v40 }
  0x8b   :  { %v153_v44 = vpop.permute.xlu2 %152 }
  0x8c   :  { %v158_v45 = vadd.f32 %v153_v44, %v134_v43 }
  0x8e   :  { %v162_v47 = vmax.f32 %v158_v45, 0.0 }
  0x8f   :  { %v38_v49 = vpop.permute.xlu1 %37 }
  0x90   :  { %216 = vmatpush.msra.mxu0 %v162_v47  ;;  %277 = vmatpush.msra.mxu2 %v162_v47  ;;  %v87_v55 = vpop.permute.xlu0 %86  ;;  %v56_v3 = vmul.f32 %v55_v25, %v38_v49 }
  0x91   :  { %278 = vmatpush.msra.mxu3 %v162_v47  ;;  %v102_v7 = vmul.f32 %v101_v30, %v87_v55 }
  0x92   :  { %v81_v6 = vadd.f32 %v77_v2, %v56_v3 }
  0x93   :  { %v148_v51 = vpop.permute.xlu2 %147 }
  0x94   :  { %v157_v52 = vadd.f32 %v148_v51, %v133_v50  ;;  %v106_v9 = vadd.f32 %v102_v7, %v81_v6 }
  0x96   :  { %v161_v53 = vmax.f32 %v157_v52, 0.0 }
  0x98   :  { %217 = vmatpush.msra.mxu0 %v161_v53  ;;  %279 = vmatpush.msra.mxu2 %v161_v53  ;;  %v91_v54 = vpop.permute.xlu1 %90 }
  0x99   :  { %280 = vmatpush.msra.mxu3 %v161_v53  ;;  %v103_v58 = vmul.f32 %v101_v30, %v91_v54  ;;  %v143_v63 = vpop.permute.xlu0 %142 }
  0x9b   :  { %v107_v61 = vadd.f32 %v103_v58, %v82_v59  ;;  %v189_v18 = vpop.permute.xlu2 %188 }
  0xa1   :  { %v116_v60 = vpop.permute.xlu1 %115  ;;  %v174_v29 = vpop.permute.xlu0 %173 }
  0xa2   :  { %v128_v62 = vmul.f32 %v126_v35, %v116_v60 }
  0xa3   :  { %v179_v25 = vpop.permute.xlu2 %178 }
  0xa4   :  { %v132_v0 = vadd.f32 %v128_v62, %v107_v61 }
  0xa6   :  { %v156_v1 = vadd.f32 %v143_v63, %v132_v0 }
  0xa8   :  { %v160_v4 = vmax.f32 %v156_v1, 0.0 }
  0xa9   :  { %v112_v5 = vpop.permute.xlu1 %111 }
  0xaa   :  { %218 = vmatpush.msra.mxu0 %v160_v4  ;;  %281 = vmatpush.msra.mxu2 %v160_v4  ;;  %v127_v8 = vmul.f32 %v126_v35, %v112_v5 }
  0xab   :  { %282 = vmatpush.msra.mxu3 %v160_v4 }
  0xac   :  { %v131_v10 = vadd.f32 %v127_v8, %v106_v9 }
  0xb2   :  { %v138_v11 = vpop.permute.xlu1 %137 }
  0xb3   :  { %v155_v12 = vadd.f32 %v138_v11, %v131_v10 }
  0xb5   :  { %v159_v13 = vmax.f32 %v155_v12, 0.0 }
  0xb7   :  { %219 = vmatpush.msra.mxu0 %v159_v13  ;;  %283 = vmatpush.msra.mxu2 %v159_v13 }
  0xb8   :  { %284 = vmatpush.msra.mxu3 %v159_v13  ;;  %272 = vmatmul.msk.f32.vlgmr.msra.gmra.mxu0 %vm191_vm0, %v163_v14 }
  0xb9   :  { %273 = vmatmul.msk.f32.vlgmr.msra.gmra.mxu2 %vm191_vm0, %v164_v15  ;;  %274 = vmatmul.msk.f32.vlgmr.msra.gmra.mxu3 %vm191_vm0, %v165_v16 }
  0xba   :  { %v184_v20 = vpop.permute.xlu1 %183 }
  0xc1   :  { %275 = vmatmul.msk.f32.gmra.mxu3 %vm191_vm0, %v166_v17 }
  0xc2   :  { %v242_v35 = vpop.permute.xlu1 %241 }
 0x135   :  { %v221_v26 = vpop.f32.mrf.mxu0 }
 0x136   :  { %v222_v30 = vadd.f32 %v221_v26, %v174_v29 }
 0x138   :  { %v233_v33 = vmax.f32 %v222_v30, 0.0 }
 0x13c   :  { %v227_v19 = vpop.f32.mrf.mxu3  ;;  %v224_v21 = vpop.f32.mrf.mxu2 }
 0x13d   :  { %v228_v23 = vadd.f32 %v227_v19, %v184_v20  ;;  %v225_v27 = vadd.f32 %v224_v21, %v179_v25 }
 0x13f   :  { %v235_v31 = vmax.f32 %v228_v23, 0.0  ;;  %v234_v32 = vmax.f32 %v225_v27, 0.0 }
 0x144   :  { %v230_v22 = vpop.f32.mrf.mxu3 }
 0x145   :  { %v231_v24 = vadd.f32 %v230_v22, %v189_v18 }
 0x147   :  { %v236_v28 = vmax.f32 %v231_v24, 0.0 }
 0x149   :  { %259 = vmatpush.msra.mxu1 %v236_v28 }
 0x14b   :  { %260 = vmatpush.msra.mxu1 %v235_v31 }
 0x14d   :  { %261 = vmatpush.msra.mxu1 %v234_v32 }
 0x14f   :  { %262 = vmatpush.msra.mxu1 %v233_v33 }
 0x150   :  { %276 = vmatmul.msk.f32.vlgmr.msra.gmra.mxu1 %vm191_vm0, %v237_v34 }
 0x1cd   :  { %v264_v36 = vpop.f32.mrf.mxu1 }
 0x1ce   :  { %v265_v37 = vadd.f32 %v264_v36, %v242_v35 }
 0x1d0   :  { %267 = vst [vmem:[%s422_s7] sm:$0xf] %v265_v37 }

</bundles_post_ra>
